<compile_context>
chip_gen: v5e
topology: v5e:2x2
jax: 0.10.0
libtpu: 0.0.40
codegen_flags: <defaults>
</compile_context>

<pallas_src>
import jax
import jax.numpy as jnp
from jax import lax
from jax.experimental import pallas as pl
from jax.experimental.pallas import tpu as pltpu

BN_EPS = 1e-5


# ----------------------------- Pallas kernels ------------------------------

def _make_stats_kernel(R, TR):
    """Single-pass per-lane sum and sum-of-squares over the row axis."""
    ragged = (R % TR) != 0

    def kernel(x_ref, sum_ref, sq_ref):
        i = pl.program_id(0)

        @pl.when(i == 0)
        def _():
            sum_ref[...] = jnp.zeros_like(sum_ref)
            sq_ref[...] = jnp.zeros_like(sq_ref)

        x = x_ref[...]
        if ragged:  # mask rows beyond R (boundary block reads are unspecified)
            rows = lax.broadcasted_iota(jnp.int32, x.shape, 0) + i * TR
            x = jnp.where(rows < R, x, 0.0)
        sum_ref[...] += jnp.sum(x, axis=0, keepdims=True)
        sq_ref[...] += jnp.sum(x * x, axis=0, keepdims=True)

    return kernel


def _conv_bn_kernel(a_ref, s_ref, b_ref, w_ref, o_ref, acc_ref):
    """out = relu(a*scale + shift) @ w   (BN+ReLU prologue, K-tiled accumulation)."""
    k = pl.program_id(2)

    @pl.when(k == 0)
    def _():
        acc_ref[...] = jnp.zeros_like(acc_ref)

    a = jnp.maximum(a_ref[...] * s_ref[...] + b_ref[...], 0.0)
    acc_ref[...] += jnp.dot(a, w_ref[...], preferred_element_type=jnp.float32)

    @pl.when(k == pl.num_programs(2) - 1)
    def _():
        o_ref[...] = acc_ref[...]


def _conv_bn_res_kernel(a_ref, s_ref, b_ref, w_ref, r_ref, o_ref, acc_ref):
    """Same as above plus fused residual add in the epilogue."""
    k = pl.program_id(2)

    @pl.when(k == 0)
    def _():
        acc_ref[...] = jnp.zeros_like(acc_ref)

    a = jnp.maximum(a_ref[...] * s_ref[...] + b_ref[...], 0.0)
    acc_ref[...] += jnp.dot(a, w_ref[...], preferred_element_type=jnp.float32)

    @pl.when(k == pl.num_programs(2) - 1)
    def _():
        o_ref[...] = acc_ref[...] + r_ref[...]


# ----------------------------- kernel wrappers ------------------------------

def pallas_bn_stats(x2d):
    """One Pallas pass over (M, C): per-channel mean and biased variance."""
    M, C = x2d.shape
    # Lane-dense view when channels pack evenly into 128 lanes.
    if (M * C) % 128 == 0 and 128 % C == 0:
        xr = x2d.reshape(-1, 128)
    else:
        xr = x2d
    R, L = xr.shape
    TR = R if R <= 1024 else 1024

    osum, osq = pl.pallas_call(
        _make_stats_kernel(R, TR),
        out_shape=(jax.ShapeDtypeStruct((1, L), jnp.float32),
                   jax.ShapeDtypeStruct((1, L), jnp.float32)),
        grid=(pl.cdiv(R, TR),),
        in_specs=[pl.BlockSpec((TR, L), lambda i: (i, 0))],
        out_specs=(pl.BlockSpec((1, L), lambda i: (0, 0)),
                   pl.BlockSpec((1, L), lambda i: (0, 0))),
        compiler_params=pltpu.CompilerParams(dimension_semantics=("arbitrary",)),
    )(xr)

    s = osum.reshape(-1, C).sum(axis=0)     # fold packed lane groups -> (C,)
    sq = osq.reshape(-1, C).sum(axis=0)
    mean = s / M
    var = sq / M - mean * mean              # biased variance (matches training BN)
    return mean, var


def _pick_k_tile(K, target=512):
    """K tile that divides K exactly (lane-aligned when tiling is needed)."""
    if K <= target:
        return K
    t = (target // 128) * 128
    while t >= 128:
        if K % t == 0:
            return t
        t -= 128
    return K


def fused_conv_matmul(a, scale_k, shift_k, w_mat, residual=None):
    """(M,K)@(K,Cout) with BN+ReLU prologue on A and optional residual epilogue."""
    M, K = a.shape
    Cout = w_mat.shape[1]
    TM = M if M <= 512 else 512
    TN = Cout if Cout <= 256 else 256
    TK = _pick_k_tile(K)
    grid = (pl.cdiv(M, TM), pl.cdiv(Cout, TN), K // TK)

    in_specs = [
        pl.BlockSpec((TM, TK), lambda i, j, k: (i, k)),
        pl.BlockSpec((1, TK), lambda i, j, k: (0, k)),
        pl.BlockSpec((1, TK), lambda i, j, k: (0, k)),
        pl.BlockSpec((TK, TN), lambda i, j, k: (k, j)),
    ]
    args = [a, scale_k.reshape(1, K), shift_k.reshape(1, K), w_mat]
    if residual is None:
        kernel = _conv_bn_kernel
    else:
        kernel = _conv_bn_res_kernel
        in_specs.append(pl.BlockSpec((TM, TN), lambda i, j, k: (i, j)))
        args.append(residual)

    return pl.pallas_call(
        kernel,
        out_shape=jax.ShapeDtypeStruct((M, Cout), jnp.float32),
        grid=grid,
        in_specs=in_specs,
        out_specs=pl.BlockSpec((TM, TN), lambda i, j, k: (i, j)),
        scratch_shapes=[pltpu.VMEM((TM, TN), jnp.float32)],
        compiler_params=pltpu.CompilerParams(
            dimension_semantics=("parallel", "parallel", "arbitrary")),
        cost_estimate=pl.CostEstimate(
            flops=2 * M * K * Cout,
            transcendentals=0,
            bytes_accessed=4 * (M * K + K * Cout + M * Cout)),
    )(*args)


# ----------------------------- conv plumbing --------------------------------

def _bn_neutral_pad(scale, shift):
    # Per-channel value v with relu(v*scale + shift) == 0, so zero-padding of the
    # post-BN-ReLU activation is reproduced by padding the RAW input with v.
    # (Valid whenever scale != 0, i.e. gamma != 0; gamma==0 would need masking.)
    safe = jnp.where(scale == 0, 1.0, scale)
    return jnp.where(scale == 0, 0.0, -shift / safe)


def _im2col(x_nhwc, kh, kw, stride, pad, pad_value=None):
    N, H, W, C = x_nhwc.shape
    if pad > 0:
        Hp, Wp = H + 2 * pad, W + 2 * pad
        if pad_value is None:
            xp = jnp.pad(x_nhwc, ((0, 0), (pad, pad), (pad, pad), (0, 0)))
        else:
            xp = jnp.broadcast_to(pad_value.reshape(1, 1, 1, C).astype(x_nhwc.dtype),
                                  (N, Hp, Wp, C))
            xp = xp.at[:, pad:pad + H, pad:pad + W, :].set(x_nhwc)
    else:
        xp = x_nhwc
    Ho = (H + 2 * pad - kh) // stride + 1
    Wo = (W + 2 * pad - kw) // stride + 1
    cols = [xp[:, i:i + stride * Ho:stride, j:j + stride * Wo:stride, :]
            for i in range(kh) for j in range(kw)]
    patches = jnp.concatenate(cols, axis=-1)            # (N, Ho, Wo, kh*kw*C)
    return patches.reshape(N * Ho * Wo, kh * kw * C), (N, Ho, Wo)


# ----------------------------- model definition -----------------------------

def init_basic_block(key, in_planes, out_planes, stride):
    k1, k2, k3 = jax.random.split(key, 3)
    he1 = (2.0 / (in_planes * 9)) ** 0.5
    he2 = (2.0 / (out_planes * 9)) ** 0.5
    p = {
        "stride": stride,
        "equal": in_planes == out_planes,
        "bn1_gamma": 1.0 + 0.01 * jnp.arange(in_planes, dtype=jnp.float32),
        "bn1_beta": 0.01 * jnp.arange(in_planes, dtype=jnp.float32),
        "conv1_w": he1 * jax.random.normal(k1, (out_planes, in_planes, 3, 3), jnp.float32),
        "bn2_gamma": 1.0 + 0.01 * jnp.arange(out_planes, dtype=jnp.float32),
        "bn2_beta": 0.01 * jnp.arange(out_planes, dtype=jnp.float32),
        "conv2_w": he2 * jax.random.normal(k2, (out_planes, out_planes, 3, 3), jnp.float32),
    }
    if not p["equal"]:
        hes = (2.0 / in_planes) ** 0.5
        p["short_w"] = hes * jax.random.normal(k3, (out_planes, in_planes, 1, 1), jnp.float32)
    return p


def basic_block_forward(p, x):
    # x: NHWC float32
    N, H, W, Cin = x.shape
    stride = p["stride"]
    x2d = x.reshape(N * H * W, Cin)

    # BN1 statistics: one Pallas reduction pass over x.
    mean1, var1 = pallas_bn_stats(x2d)
    scale1 = p["bn1_gamma"] / jnp.sqrt(var1 + BN_EPS)
    shift1 = p["bn1_beta"] - mean1 * scale1
    pad1 = _bn_neutral_pad(scale1, shift1)

    # conv1 (3x3, stride): BN1+ReLU fused into the matmul prologue.
    patches1, (N, Ho, Wo) = _im2col(x, 3, 3, stride, 1, pad_value=pad1)
    w1 = jnp.transpose(p["conv1_w"], (2, 3, 1, 0)).reshape(9 * Cin, -1)
    Cout = w1.shape[1]
    h1 = fused_conv_matmul(patches1, jnp.tile(scale1, 9), jnp.tile(shift1, 9), w1)

    # BN2 statistics over conv1 output (still 2-D row-major = flattened NHWC).
    mean2, var2 = pallas_bn_stats(h1)
    scale2 = p["bn2_gamma"] / jnp.sqrt(var2 + BN_EPS)
    shift2 = p["bn2_beta"] - mean2 * scale2
    pad2 = _bn_neutral_pad(scale2, shift2)

    # shortcut: identity, or 1x1 strided conv of BN1+ReLU(x) (prologue-fused, pad=0).
    if p["equal"]:
        shortcut2d = x2d
    else:
        xs2d = x[:, ::stride, ::stride, :].reshape(N * Ho * Wo, Cin)
        ws = jnp.transpose(p["short_w"], (2, 3, 1, 0)).reshape(Cin, Cout)
        shortcut2d = fused_conv_matmul(xs2d, scale1, shift1, ws)

    # conv2 (3x3, stride 1): BN2+ReLU prologue + residual-add epilogue.
    h1_nhwc = h1.reshape(N, Ho, Wo, Cout)
    patches2, _ = _im2col(h1_nhwc, 3, 3, 1, 1, pad_value=pad2)
    w2 = jnp.transpose(p["conv2_w"], (2, 3, 1, 0)).reshape(9 * Cout, Cout)
    out2d = fused_conv_matmul(patches2, jnp.tile(scale2, 9), jnp.tile(shift2, 9), w2,
                              residual=shortcut2d)
    return out2d.reshape(N, Ho, Wo, Cout)


def init_network_block(key, nb_layers, in_planes, out_planes, stride):
    keys = jax.random.split(key, nb_layers)
    params = []
    for i in range(nb_layers):
        params.append(init_basic_block(
            keys[i],
            in_planes if i == 0 else out_planes,
            out_planes,
            stride if i == 0 else 1))
    return params


def network_block_forward(params, x_nchw):
    x = jnp.transpose(x_nchw, (0, 2, 3, 1))           # NCHW -> NHWC
    for p in params:
        x = basic_block_forward(p, x)
    return jnp.transpose(x, (0, 3, 1, 2))             # back to NCHW


# ----------------------------- pure-JAX reference ----------------------------

def _ref_conv(x_nhwc, w_oihw, stride, pad):
    return lax.conv_general_dilated(
        x_nhwc, jnp.transpose(w_oihw, (2, 3, 1, 0)),
        window_strides=(stride, stride), padding=[(pad, pad), (pad, pad)],
        dimension_numbers=("NHWC", "HWIO", "NHWC"))


def _ref_bn_relu(x, gamma, beta):
    mean = jnp.mean(x, axis=(0, 1, 2))
    var = jnp.mean((x - mean) ** 2, axis=(0, 1, 2))
    return jnp.maximum((x - mean) / jnp.sqrt(var + BN_EPS) * gamma + beta, 0.0)


def _ref_block(p, x):
    if not p["equal"]:
        x = _ref_bn_relu(x, p["bn1_gamma"], p["bn1_beta"])
        out = x
    else:
        out = _ref_bn_relu(x, p["bn1_gamma"], p["bn1_beta"])
    out = _ref_conv(out, p["conv1_w"], p["stride"], 1)
    out = _ref_bn_relu(out, p["bn2_gamma"], p["bn2_beta"])
    out = _ref_conv(out, p["conv2_w"], 1, 1)
    shortcut = x if p["equal"] else _ref_conv(x, p["short_w"], p["stride"], 0)
    return shortcut + out


def _ref_forward(params, x_nchw):
    x = jnp.transpose(x_nchw, (0, 2, 3, 1))
    for p in params:
        x = _ref_block(p, x)
    return jnp.transpose(x, (0, 3, 1, 2))


# ---------------------------------- main -------------------------------------

if __name__ == "__main__":
    key = jax.random.PRNGKey(0)
    kx, kp = jax.random.split(key)

    # NetworkBlock(nb_layers=2, in_planes=4, out_planes=8, block=BasicBlock, stride=2)
    nb_layers, in_planes, out_planes, stride = 2, 4, 8, 2
    x = jax.random.normal(kx, (2, in_planes, 16, 16), jnp.float32)  # NCHW

    params = init_network_block(kp, nb_layers, in_planes, out_planes, stride)

    y = network_block_forward(params, x)
    y = jax.block_until_ready(y)

    y_ref = jax.block_until_ready(_ref_forward(params, x))
    assert y.shape == (2, out_planes, 8, 8)
    assert jnp.allclose(y, y_ref, atol=1e-3, rtol=1e-3), "mismatch vs. pure-JAX reference"

    print("KERNEL_OK")
</pallas_src>

<mosaic_0001>
module attributes {stable_mosaic.version = 11 : i64} {
  func.func @kernel(%arg0: i32, %arg1: memref<16x128xf32, #tpu.memory_space<vmem>>, %arg2: memref<1x128xf32, #tpu.memory_space<vmem>>, %arg3: memref<1x128xf32, #tpu.memory_space<vmem>>) attributes {dimension_semantics = [#tpu.dimension_semantics<arbitrary>], iteration_bounds = array<i64: 1>, scalar_prefetch = 0 : i64, scratch_operands = 0 : i64, tpu.core_type = #tpu.core_type<tc>, window_params = [{transform_indices = @transform_0, window_bounds = array<i64: 16, 128>}, {pipeline_mode = #tpu.pipeline_mode<synchronous>, transform_indices = @transform_1, window_bounds = array<i64: 1, 128>}, {pipeline_mode = #tpu.pipeline_mode<synchronous>, transform_indices = @transform_2, window_bounds = array<i64: 1, 128>}]} {
    %c0_i32 = arith.constant 0 : i32
    %0 = arith.cmpi eq, %arg0, %c0_i32 : i32
    %1 = arith.extui %0 : i1 to i32
    %c0_i32_0 = arith.constant 0 : i32
    %2 = arith.cmpi ne, %1, %c0_i32_0 : i32
    scf.if %2 {
      %cst_11 = arith.constant 0.000000e+00 : f32
      %15 = vector.broadcast %cst_11 : f32 to vector<1x128xf32>
      %c0_12 = arith.constant 0 : index
      %c0_13 = arith.constant 0 : index
      %16 = vector.load %arg2[%c0_12, %c0_13] : memref<1x128xf32, #tpu.memory_space<vmem>>, vector<1x128xf32>
      tpu.vector_store %arg2[%c0_12, %c0_13], %15 {strides = array<i32>} : memref<1x128xf32, #tpu.memory_space<vmem>>, vector<1x128xf32>,
      %cst_14 = arith.constant 0.000000e+00 : f32
      %17 = vector.broadcast %cst_14 : f32 to vector<1x128xf32>
      %c0_15 = arith.constant 0 : index
      %c0_16 = arith.constant 0 : index
      %18 = vector.load %arg3[%c0_15, %c0_16] : memref<1x128xf32, #tpu.memory_space<vmem>>, vector<1x128xf32>
      tpu.vector_store %arg3[%c0_15, %c0_16], %17 {strides = array<i32>} : memref<1x128xf32, #tpu.memory_space<vmem>>, vector<1x128xf32>,
    } else {
    }
    %c0 = arith.constant 0 : index
    %c0_1 = arith.constant 0 : index
    %3 = vector.load %arg1[%c0, %c0_1] : memref<16x128xf32, #tpu.memory_space<vmem>>, vector<16x128xf32>
    %c0_2 = arith.constant 0 : index
    %c0_3 = arith.constant 0 : index
    %4 = vector.load %arg2[%c0_2, %c0_3] : memref<1x128xf32, #tpu.memory_space<vmem>>, vector<1x128xf32>
    %cst = arith.constant dense<0.000000e+00> : vector<128xf32>
    %5 = vector.multi_reduction <add>, %3, %cst [0] : vector<16x128xf32> to vector<128xf32>
    %6 = vector.shape_cast %5 : vector<128xf32> to vector<1x128xf32>
    %7 = arith.addf %4, %6 : vector<1x128xf32>
    %c0_4 = arith.constant 0 : index
    %c0_5 = arith.constant 0 : index
    %8 = vector.load %arg2[%c0_4, %c0_5] : memref<1x128xf32, #tpu.memory_space<vmem>>, vector<1x128xf32>
    tpu.vector_store %arg2[%c0_4, %c0_5], %7 {strides = array<i32>} : memref<1x128xf32, #tpu.memory_space<vmem>>, vector<1x128xf32>,
    %c0_6 = arith.constant 0 : index
    %c0_7 = arith.constant 0 : index
    %9 = vector.load %arg3[%c0_6, %c0_7] : memref<1x128xf32, #tpu.memory_space<vmem>>, vector<1x128xf32>
    %10 = arith.mulf %3, %3 : vector<16x128xf32>
    %cst_8 = arith.constant dense<0.000000e+00> : vector<128xf32>
    %11 = vector.multi_reduction <add>, %10, %cst_8 [0] : vector<16x128xf32> to vector<128xf32>
    %12 = vector.shape_cast %11 : vector<128xf32> to vector<1x128xf32>
    %13 = arith.addf %9, %12 : vector<1x128xf32>
    %c0_9 = arith.constant 0 : index
    %c0_10 = arith.constant 0 : index
    %14 = vector.load %arg3[%c0_9, %c0_10] : memref<1x128xf32, #tpu.memory_space<vmem>>, vector<1x128xf32>
    tpu.vector_store %arg3[%c0_9, %c0_10], %13 {strides = array<i32>} : memref<1x128xf32, #tpu.memory_space<vmem>>, vector<1x128xf32>,
    return
  }
  func.func @transform_0(%arg0: i32) -> (i32, i32) {
    %c0_i32 = arith.constant 0 : i32
    %c0_i32_0 = arith.constant 0 : i32
    return %arg0, %c0_i32 : i32, i32
  }
  func.func @transform_1(%arg0: i32) -> (i32, i32) {
    %c0_i32 = arith.constant 0 : i32
    %c0_i32_0 = arith.constant 0 : i32
    %c0_i32_1 = arith.constant 0 : i32
    return %c0_i32, %c0_i32_0 : i32, i32
  }
  func.func @transform_2(%arg0: i32) -> (i32, i32) {
    %c0_i32 = arith.constant 0 : i32
    %c0_i32_0 = arith.constant 0 : i32
    %c0_i32_1 = arith.constant 0 : i32
    return %c0_i32, %c0_i32_0 : i32, i32
  }
}

</mosaic_0001>

<bundles_post_ra>
// kernel: tpu_custom_call.1
= control target key start
LH: loop header
LB: loop body
LE: loop exit
PB: predicated region body
PF: predicated region fallthrough
CT: control target
= control target key end

     0   :  { %8 = vsyncpa [#allocation3], 0  ;;  %s205_s0 = inlined_call_operand.hbm [shape: f32[16,128], index: 0, kind: input, shape index: {}]   ;;  %s206_s1 = inlined_call_operand.hbm [shape: f32[1,128], index: 1, kind: output, shape index: {0}]   ;;  %s207_s2 = inlined_call_operand.hbm [shape: f32[1,128], index: 2, kind: output, shape index: {1}]  }
   0x1   :  { %9 = vsyncpa [#allocation4], 0 }
   0x2   :  { %10 = vsyncpa [#allocation7], 0  ;;  %s15_s11 = sshll.u32 %s205_s0, 4  ;;  %s175_s12 = smov [#allocation2]   ;;  %s16_s11 = int_to_ptr.hbm [resolvable:$true] %s15_s11 }
   0x3   :  { %s17_s13 = sshll.u32 %s175_s12, 4  ;;  %s176_s14 = smov 128   ;;  %s18_s13 = int_to_ptr.vmem [resolvable:$true] %s17_s13 }
   0x4   :  { %s177_s15 = smov 8  }
   0x5   :  { %23 = dma.hbm_to_vmem [thread:$0]  %s16_s11, 256, %s18_s13, [#allocation3], %s176_s14, %s176_s14, %s177_s15  }
   0x6   :  { %169 = dma.done.wait [#allocation3], 256  }
   0x7   :  { %170 = vsyncadd [#allocation3], 4294967040  ;;  %v178_v0 = vmov 0.0   ;;  %v34_v1 = vld [vmem:[#allocation2] sm:$0xff]  ;;  %v35_v2 = vld [vmem:[#allocation2 + $0x8] sm:$0xff]  ;;  %s179_s0 = smov [#allocation5]  }
   0x8   :  { %32 = vst [vmem:[#allocation5] sm:$0x1] %v178_v0  ;;  %v37_v3 = vadd.f32 %v35_v2, %v34_v1  ;;  %v47_v4 = vmul.f32 %v34_v1, %v34_v1  ;;  %v48_v5 = vmul.f32 %v35_v2, %v35_v2  ;;  %s63_s16 = sshll.u32 %s179_s0, 4  ;;  %s65_s19 = sshll.u32 %s206_s1, 4  ;;  %s64_s16 = int_to_ptr.vmem [resolvable:$true] %s63_s16  ;;  %s66_s19 = int_to_ptr.hbm [resolvable:$true] %s65_s19 }
   0x9   :  { %33 = vst [vmem:[#allocation6] sm:$0x1] %v178_v0  ;;  %s180_s20 = smov [#allocation6]   ;;  %s76_s24 = sshll.u32 %s207_s2, 4  ;;  %s77_s24 = int_to_ptr.hbm [resolvable:$true] %s76_s24 }
   0xa   :  { %v38_v6 = vrot.slane %v37_v3, 4  ;;  %v49_v7 = vadd.f32 %v48_v5, %v47_v4  ;;  %s74_s21 = sshll.u32 %s180_s20, 4  ;;  %s75_s21 = int_to_ptr.vmem [resolvable:$true] %s74_s21 }
   0xc   :  { %v39_v8 = vadd.f32 %v38_v6, %v37_v3  ;;  %v50_v9 = vrot.slane %v49_v7, 4 }
   0xe   :  { %v40_v10 = vrot.slane %v39_v8, 2  ;;  %v51_v11 = vadd.f32 %v50_v9, %v49_v7 }
   0xf   :  { %v36_v16 = vld [vmem:[#allocation5] sm:$0x1] }
  0x10   :  { %v41_v12 = vadd.f32 %v40_v10, %v39_v8  ;;  %v52_v13 = vrot.slane %v51_v11, 2  ;;  %v46_v19 = vld [vmem:[#allocation6] sm:$0x1] }
  0x12   :  { %v42_v14 = vrot.slane %v41_v12, 1  ;;  %v53_v15 = vadd.f32 %v52_v13, %v51_v11 }
  0x14   :  { %v43_v17 = vadd.f32 %v42_v14, %v41_v12  ;;  %v54_v18 = vrot.slane %v53_v15, 1 }
  0x16   :  { %v44_v20 = vadd.f32 %v43_v17, %v36_v16  ;;  %v55_v21 = vadd.f32 %v54_v18, %v53_v15 }
  0x18   :  { %45 = vst [vmem:[#allocation5] sm:$0x1] %v44_v20  ;;  %v56_v22 = vadd.f32 %v55_v21, %v46_v19 }
  0x19   :  { %68 = dma.vmem_to_hbm [thread:$0]  %s64_s16, 16, %s66_s19, [#allocation4]  }
  0x1a   :  { %57 = vst [vmem:[#allocation6] sm:$0x1] %v56_v22 }
  0x1b   :  { %79 = dma.vmem_to_hbm [thread:$0]  %s75_s21, 16, %s77_s24, [#allocation7]  }
  0x1c   :  { %171 = dma.done.wait [#allocation4], 16  }
  0x1d   :  { %172 = vsyncadd [#allocation4], 4294967280 }
  0x1e   :  { %173 = dma.done.wait [#allocation7], 16  }
  0x1f   :  { %174 = vsyncadd [#allocation7], 4294967280 }
  0x20   :  { %88 = vsyncpa [#allocation3], 1 }
  0x21   :  { %89 = vsyncpa [#allocation4], 1 }
  0x22   :  { %90 = vsyncpa [#allocation7], 1 }

</bundles_post_ra>
